<compile_context>
chip_gen: v7x
topology: tpu7x:2x2x1
jax: 0.10.0
libtpu: 0.0.40
codegen_flags: <defaults>
</compile_context>

<pallas_src>
import functools

import jax
import jax.numpy as jnp
from jax import lax
from jax.experimental import pallas as pl
from jax.experimental.pallas import tpu as pltpu


def _transform_kernel(x_ref, wt_ref, b_ref, gamma_ref, beta_ref, o_ref, *,
                      eps, hidden, n_chunks, chunk_m, precision,
                      approximate_gelu):
    # x_ref:     (TM, H)  token rows, input dtype (fed straight to the MXU)
    # wt_ref:    (H, H)   pre-transposed dense weight  (W^T, i.e. [in, out])
    # b_ref:     (1, H)   dense bias
    # gamma_ref: (1, H)   LayerNorm weight
    # beta_ref:  (1, H)   LayerNorm bias
    # o_ref:     (TM, H)  output

    wt = wt_ref[...]
    bias = b_ref[...].astype(jnp.float32)
    gamma = gamma_ref[...].astype(jnp.float32)
    beta = beta_ref[...].astype(jnp.float32)
    inv_h = jnp.float32(1.0 / hidden)

    def matmul_chunk(j):
        # Static (unrolled) sub-chunk start; MXU matmul in input dtype with
        # f32 accumulation.
        start = j * chunk_m
        return jnp.dot(x_ref[pl.ds(start, chunk_m), :], wt,
                       preferred_element_type=jnp.float32,
                       precision=precision)

    def epilogue(h):
        # h: (chunk_m, H) f32 matmul accumulator.
        h = h + bias
        if approximate_gelu:
            # TODO(synk): tanh-approx GELU (EUP tanh) differs numerically from
            # BERT's exact "gelu"; only enable after validating tolerances.
            h = jax.nn.gelu(h, approximate=True)
        else:
            # Exact GELU (erf form), as used by BERT's ACT2FN["gelu"].
            h = 0.5 * h * (1.0 + lax.erf(h * jnp.float32(0.7071067811865476)))
        # One-pass LayerNorm over the hidden (lane) dim, biased variance.
        # sum(h) and sum(h*h) issue back-to-back on the XLU; rsqrt on the EUP.
        s1 = jnp.sum(h, axis=-1, keepdims=True)
        s2 = jnp.sum(h * h, axis=-1, keepdims=True)
        mean = s1 * inv_h
        var = s2 * inv_h - mean * mean
        inv_std = lax.rsqrt(var + jnp.float32(eps))
        return ((h - mean) * inv_std) * gamma + beta

    # Software pipeline across sub-chunks: matmul(j+1) has no data dependency
    # on epilogue(j), so the scheduler overlaps MXU with VPU/EUP/XLU work.
    # NOTE: on a ragged last row-tile the padded rows run this math on garbage
    # data; Pallas masks the writeback, so outputs remain correct. Do NOT add
    # any cross-row reduction here.
    h_cur = matmul_chunk(0)
    for j in range(1, n_chunks):
        h_nxt = matmul_chunk(j)
        o_ref[pl.ds((j - 1) * chunk_m, chunk_m), :] = (
            epilogue(h_cur).astype(o_ref.dtype))
        h_cur = h_nxt
    o_ref[pl.ds((n_chunks - 1) * chunk_m, chunk_m), :] = (
        epilogue(h_cur).astype(o_ref.dtype))


def bert_prediction_head_transform(hidden_states, weight, bias, gamma, beta,
                                   *, eps=1e-12, tile_m=512,
                                   approximate_gelu=False):
    """hidden_states: [..., H].  weight: [H, H] in PyTorch nn.Linear layout ([out, in])."""
    orig_shape = hidden_states.shape
    H = orig_shape[-1]
    x = hidden_states.reshape(-1, H)
    M = x.shape[0]

    # Pre-transpose the static weight once (outside the kernel).
    wt = jnp.transpose(weight)            # [H_in, H_out]
    bias2 = bias.reshape(1, H)
    gamma2 = gamma.reshape(1, H)
    beta2 = beta.reshape(1, H)

    # ---- Row tiling -------------------------------------------------------
    # 512 rows amortizes the ~0.35 us per-grid-step overhead while keeping
    # x/out double buffers + resident W^T far inside VMEM on every generation.
    tile_m = min(tile_m, M)
    if M >= 256:
        # Keep >=2 grid steps so both v7x TensorCores get work (harmless on
        # single-TC v5e/v6e).
        half = (((M + 1) // 2) + 7) // 8 * 8
        tile_m = min(tile_m, half)
    if tile_m < M:
        tile_m = max(8, (tile_m // 8) * 8)
    grid = (pl.cdiv(M, tile_m),)

    # ---- Intra-tile sub-chunking (MXU / epilogue overlap) -----------------
    # Target ~128-row chunks; require the chunk to be sublane-aligned and not
    # so small that per-chunk overhead dominates.
    n_chunks = 1
    for cand in (4, 2):
        cm = tile_m // cand
        if tile_m % cand == 0 and cm % 8 == 0 and cm >= 64:
            n_chunks = cand
            break
    chunk_m = tile_m // n_chunks

    # f32 inputs: force full-precision MXU passes so large H stays within
    # tolerance of an f32 reference. bf16 inputs: native bf16 MXU + f32 acc.
    precision = (lax.Precision.HIGHEST
                 if hidden_states.dtype == jnp.float32 else None)

    # ---- Cost estimate (per-operand itemsizes) ----------------------------
    x_it = jnp.dtype(hidden_states.dtype).itemsize
    w_it = jnp.dtype(weight.dtype).itemsize
    p_it = jnp.dtype(bias.dtype).itemsize
    cost = pl.CostEstimate(
        flops=2 * M * H * H + 12 * M * H,
        transcendentals=M * H,                               # erf
        bytes_accessed=2 * M * H * x_it + H * H * w_it + 3 * H * p_it,
    )

    # ---- VMEM limit: working set with headroom, capped below v7x physical --
    working_set = (
        2 * 2 * tile_m * H * x_it          # double-buffered x + out tiles
        + H * H * w_it                     # resident W^T
        + 3 * H * p_it                     # bias / gamma / beta
        + 4 * chunk_m * H * 4              # in-flight f32 chunk intermediates
    )
    vmem_limit = min(max(2 * working_set, 32 * 1024 * 1024), 48 * 1024 * 1024)

    # Grid-invariant operands: single-buffered, resident across the row grid.
    resident = dict(pipeline_mode=pl.Buffered(buffer_count=1))

    kernel = functools.partial(
        _transform_kernel, eps=eps, hidden=H, n_chunks=n_chunks,
        chunk_m=chunk_m, precision=precision,
        approximate_gelu=approximate_gelu)

    out = pl.pallas_call(
        kernel,
        out_shape=jax.ShapeDtypeStruct((M, H), hidden_states.dtype),
        grid_spec=pltpu.PrefetchScalarGridSpec(
            num_scalar_prefetch=0,
            grid=grid,
            in_specs=[
                pl.BlockSpec((tile_m, H), lambda i: (i, 0)),          # x rows
                pl.BlockSpec((H, H), lambda i: (0, 0), **resident),   # W^T (resident)
                pl.BlockSpec((1, H), lambda i: (0, 0), **resident),   # dense bias
                pl.BlockSpec((1, H), lambda i: (0, 0), **resident),   # LN gamma
                pl.BlockSpec((1, H), lambda i: (0, 0), **resident),   # LN beta
            ],
            out_specs=pl.BlockSpec((tile_m, H), lambda i: (i, 0)),
        ),
        compiler_params=pltpu.CompilerParams(
            dimension_semantics=("parallel",),   # independent row tiles
            vmem_limit_bytes=vmem_limit,
        ),
        cost_estimate=cost,
    )(x, wt, bias2, gamma2, beta2)

    return out.reshape(orig_shape)


def _reference(x, weight, bias, gamma, beta, eps=1e-12):
    h = x.astype(jnp.float32) @ weight.astype(jnp.float32).T + bias.astype(jnp.float32)
    h = 0.5 * h * (1.0 + lax.erf(h / jnp.sqrt(2.0)))
    mean = jnp.mean(h, axis=-1, keepdims=True)
    var = jnp.mean((h - mean) ** 2, axis=-1, keepdims=True)
    return ((h - mean) * lax.rsqrt(var + eps)) * gamma + beta


if __name__ == "__main__":
    # Small config consistent with the module: batch=2, seq=8, hidden=32
    batch, seq, hidden = 2, 8, 32
    eps = 1e-12

    key = jax.random.PRNGKey(0)
    k_x, k_w, k_b, k_g, k_be = jax.random.split(key, 5)

    hidden_states = jax.random.normal(k_x, (batch, seq, hidden), dtype=jnp.float32)
    dense_weight = jax.random.normal(k_w, (hidden, hidden), dtype=jnp.float32) * 0.02
    dense_bias = jax.random.normal(k_b, (hidden,), dtype=jnp.float32) * 0.02
    ln_gamma = 1.0 + 0.01 * jax.random.normal(k_g, (hidden,), dtype=jnp.float32)
    ln_beta = 0.01 * jax.random.normal(k_be, (hidden,), dtype=jnp.float32)

    out = bert_prediction_head_transform(
        hidden_states, dense_weight, dense_bias, ln_gamma, ln_beta, eps=eps
    )
    jax.block_until_ready(out)

    ref = _reference(
        hidden_states.reshape(-1, hidden), dense_weight, dense_bias, ln_gamma, ln_beta, eps
    ).reshape(batch, seq, hidden)
    assert jnp.allclose(out, ref, atol=1e-5, rtol=1e-5), "mismatch vs reference"

    print("KERNEL_OK")
</pallas_src>

<mosaic_0001>
module attributes {stable_mosaic.version = 11 : i64} {
  func.func @_transform_kernel(%arg0: i32, %arg1: memref<16x32xf32, #tpu.memory_space<vmem>>, %arg2: memref<32x32xf32, #tpu.memory_space<vmem>>, %arg3: memref<1x32xf32, #tpu.memory_space<vmem>>, %arg4: memref<1x32xf32, #tpu.memory_space<vmem>>, %arg5: memref<1x32xf32, #tpu.memory_space<vmem>>, %arg6: memref<16x32xf32, #tpu.memory_space<vmem>>) attributes {dimension_semantics = [#tpu.dimension_semantics<parallel>], iteration_bounds = array<i64: 1>, scalar_prefetch = 0 : i64, scratch_operands = 0 : i64, tpu.core_type = #tpu.core_type<tc>, window_params = [{transform_indices = @transform_0, window_bounds = array<i64: 16, 32>}, {pipeline_mode = #tpu.pipeline_mode<synchronous>, transform_indices = @transform_1, window_bounds = array<i64: 32, 32>}, {pipeline_mode = #tpu.pipeline_mode<synchronous>, transform_indices = @transform_2, window_bounds = array<i64: 1, 32>}, {pipeline_mode = #tpu.pipeline_mode<synchronous>, transform_indices = @transform_3, window_bounds = array<i64: 1, 32>}, {pipeline_mode = #tpu.pipeline_mode<synchronous>, transform_indices = @transform_4, window_bounds = array<i64: 1, 32>}, {transform_indices = @transform_5, window_bounds = array<i64: 16, 32>}]} {
    %c0 = arith.constant 0 : index
    %c0_0 = arith.constant 0 : index
    %0 = vector.load %arg2[%c0, %c0_0] : memref<32x32xf32, #tpu.memory_space<vmem>>, vector<32x32xf32>
    %c0_1 = arith.constant 0 : index
    %c0_2 = arith.constant 0 : index
    %1 = vector.load %arg3[%c0_1, %c0_2] : memref<1x32xf32, #tpu.memory_space<vmem>>, vector<1x32xf32>
    %c0_3 = arith.constant 0 : index
    %c0_4 = arith.constant 0 : index
    %2 = vector.load %arg4[%c0_3, %c0_4] : memref<1x32xf32, #tpu.memory_space<vmem>>, vector<1x32xf32>
    %c0_5 = arith.constant 0 : index
    %c0_6 = arith.constant 0 : index
    %3 = vector.load %arg5[%c0_5, %c0_6] : memref<1x32xf32, #tpu.memory_space<vmem>>, vector<1x32xf32>
    %c0_7 = arith.constant 0 : index
    %c0_8 = arith.constant 0 : index
    %4 = vector.load %arg1[%c0_7, %c0_8] : memref<16x32xf32, #tpu.memory_space<vmem>>, vector<16x32xf32>
    %cst = arith.constant dense<0.000000e+00> : vector<16x32xf32>
    %5 = tpu.matmul %4, %0, %cst {dimension_numbers = #tpu.dot_dimension_numbers<[1], [0], [0], [1], [0, 0, 1, 1], [], []>, precision = #tpu.contract_precision<fp32>} : vector<16x32xf32>, vector<32x32xf32>, vector<16x32xf32> -> vector<16x32xf32>
    %6 = vector.broadcast %1 : vector<1x32xf32> to vector<16x32xf32>
    %7 = arith.addf %5, %6 : vector<16x32xf32>
    %cst_9 = arith.constant 5.000000e-01 : f32
    %8 = vector.broadcast %cst_9 : f32 to vector<16x32xf32>
    %9 = arith.mulf %8, %7 : vector<16x32xf32>
    %cst_10 = arith.constant 0.707106769 : f32
    %10 = vector.broadcast %cst_10 : f32 to vector<16x32xf32>
    %11 = arith.mulf %7, %10 : vector<16x32xf32>
    %12 = math.erf %11 : vector<16x32xf32>
    %cst_11 = arith.constant 1.000000e+00 : f32
    %13 = vector.broadcast %cst_11 : f32 to vector<16x32xf32>
    %14 = arith.addf %13, %12 : vector<16x32xf32>
    %15 = arith.mulf %9, %14 : vector<16x32xf32>
    %cst_12 = arith.constant dense<0.000000e+00> : vector<16xf32>
    %16 = vector.multi_reduction <add>, %15, %cst_12 [1] : vector<16x32xf32> to vector<16xf32>
    %17 = vector.shape_cast %16 : vector<16xf32> to vector<16x1xf32>
    %18 = arith.mulf %15, %15 : vector<16x32xf32>
    %cst_13 = arith.constant dense<0.000000e+00> : vector<16xf32>
    %19 = vector.multi_reduction <add>, %18, %cst_13 [1] : vector<16x32xf32> to vector<16xf32>
    %20 = vector.shape_cast %19 : vector<16xf32> to vector<16x1xf32>
    %cst_14 = arith.constant 3.125000e-02 : f32
    %21 = vector.broadcast %cst_14 : f32 to vector<16x1xf32>
    %22 = arith.mulf %17, %21 : vector<16x1xf32>
    %cst_15 = arith.constant 3.125000e-02 : f32
    %23 = vector.broadcast %cst_15 : f32 to vector<16x1xf32>
    %24 = arith.mulf %20, %23 : vector<16x1xf32>
    %25 = arith.mulf %22, %22 : vector<16x1xf32>
    %26 = arith.subf %24, %25 : vector<16x1xf32>
    %cst_16 = arith.constant 9.99999996E-13 : f32
    %27 = vector.broadcast %cst_16 : f32 to vector<16x1xf32>
    %28 = arith.addf %26, %27 : vector<16x1xf32>
    %29 = math.rsqrt %28 : vector<16x1xf32>
    %30 = vector.broadcast %22 : vector<16x1xf32> to vector<16x32xf32>
    %31 = arith.subf %15, %30 : vector<16x32xf32>
    %32 = vector.broadcast %29 : vector<16x1xf32> to vector<16x32xf32>
    %33 = arith.mulf %31, %32 : vector<16x32xf32>
    %34 = vector.broadcast %2 : vector<1x32xf32> to vector<16x32xf32>
    %35 = arith.mulf %33, %34 : vector<16x32xf32>
    %36 = vector.broadcast %3 : vector<1x32xf32> to vector<16x32xf32>
    %37 = arith.addf %35, %36 : vector<16x32xf32>
    %c0_17 = arith.constant 0 : index
    %c0_18 = arith.constant 0 : index
    %38 = vector.load %arg6[%c0_17, %c0_18] : memref<16x32xf32, #tpu.memory_space<vmem>>, vector<16x32xf32>
    tpu.vector_store %arg6[%c0_17, %c0_18], %37 {strides = array<i32>} : memref<16x32xf32, #tpu.memory_space<vmem>>, vector<16x32xf32>,
    return
  }
  func.func @transform_0(%arg0: i32) -> (i32, i32) {
    %c0_i32 = arith.constant 0 : i32
    %c0_i32_0 = arith.constant 0 : i32
    return %arg0, %c0_i32 : i32, i32
  }
  func.func @transform_1(%arg0: i32) -> (i32, i32) {
    %c0_i32 = arith.constant 0 : i32
    %c0_i32_0 = arith.constant 0 : i32
    %c0_i32_1 = arith.constant 0 : i32
    return %c0_i32, %c0_i32_0 : i32, i32
  }
  func.func @transform_2(%arg0: i32) -> (i32, i32) {
    %c0_i32 = arith.constant 0 : i32
    %c0_i32_0 = arith.constant 0 : i32
    %c0_i32_1 = arith.constant 0 : i32
    return %c0_i32, %c0_i32_0 : i32, i32
  }
  func.func @transform_3(%arg0: i32) -> (i32, i32) {
    %c0_i32 = arith.constant 0 : i32
    %c0_i32_0 = arith.constant 0 : i32
    %c0_i32_1 = arith.constant 0 : i32
    return %c0_i32, %c0_i32_0 : i32, i32
  }
  func.func @transform_4(%arg0: i32) -> (i32, i32) {
    %c0_i32 = arith.constant 0 : i32
    %c0_i32_0 = arith.constant 0 : i32
    %c0_i32_1 = arith.constant 0 : i32
    return %c0_i32, %c0_i32_0 : i32, i32
  }
  func.func @transform_5(%arg0: i32) -> (i32, i32) {
    %c0_i32 = arith.constant 0 : i32
    %c0_i32_0 = arith.constant 0 : i32
    return %arg0, %c0_i32 : i32, i32
  }
}

</mosaic_0001>

<bundles_post_ra>
// kernel: tpu_custom_call.1
= control target key start
LH: loop header
LB: loop body
LE: loop exit
PB: predicated region body
PF: predicated region fallthrough
CT: control target
= control target key end

     0   :  { %10 = vsyncpa [#allocation3], 0  ;;  %s1034_s0 = inlined_call_operand.hbm [shape: f32[16,32], index: 0, kind: input, shape index: {}]   ;;  %s1035_s1 = inlined_call_operand.hbm [shape: f32[32,32], index: 1, kind: input, shape index: {}]   ;;  %s1036_s2 = inlined_call_operand.vmem [shape: f32[1,32], index: 2, kind: input, shape index: {}]   ;;  %s1037_s3 = inlined_call_operand.vmem [shape: f32[1,32], index: 3, kind: input, shape index: {}]   ;;  %s1038_s4 = inlined_call_operand.vmem [shape: f32[1,32], index: 4, kind: input, shape index: {}]   ;;  %s1039_s5 = inlined_call_operand.hbm [shape: f32[16,32], index: 5, kind: output, shape index: {}]  }
   0x1   :  { %11 = vsyncpa [#allocation6], 0 }
   0x2   :  { %12 = vsyncpa [#allocation4], 0  ;;  %s925_s18 = smov [#allocation2]   ;;  %s853_s22 = scalar_lea.hbm %s1034_s0, 256 }
   0x3   :  { %s18_s19 = sshll.u32 %s925_s18, 4  ;;  %p854_p0 = scmp.ne.s32.totalorder %s1034_s0, %s853_s22  ;;  %s19_s19 = int_to_ptr.vmem [resolvable:$true] %s18_s19 }
   0x4   :  { %p857_p1 = scmp.lt.u32.totalorder %s853_s22, %s1034_s0 }
   0x6   :  { %p859_p2 = pnand %p857_p1, %p854_p0 }
   0x8   :  { %862 = shalt.err (!%p859_p2)
}
   0x9   :  { %s863_s27 = scalar_lea.vmem %s19_s19, 256  ;;  %p868_p4 = scmp.lt.s32.totalorder %s19_s19, %s19_s19 }
   0xa   :  { %p864_p3 = scmp.ne.s32.totalorder %s19_s19, %s863_s27  ;;  %p869_p5 = scmp.lt.s32.totalorder %s863_s27, %s863_s27 }
   0xc   :  { %p870_p6 = por %p869_p5, %p868_p4 }
   0xe   :  { %p871_p7 = pnand %p870_p6, %p864_p3 }
  0x10   :  { %874 = shalt.err (!%p871_p7)
}
  0x11   :  { %s926_s28 = smov 128   ;;  %s927_s29 = smov 8  }
  0x12   :  { %24 = dma.hbm_to_vmem [thread:$0]  %s1034_s0, 256, %s19_s19, [#allocation3], %s926_s28, %s926_s28, %s927_s29  }
  0x13   :  { %s928_s7 = smov [#allocation5]   ;;  %s875_s11 = scalar_lea.hbm %s1035_s1, 512 }
  0x14   :  { %s30_s8 = sshll.u32 %s928_s7, 4  ;;  %p876_p8 = scmp.ne.s32.totalorder %s1035_s1, %s875_s11  ;;  %s31_s8 = int_to_ptr.vmem [resolvable:$true] %s30_s8 }
  0x15   :  { %p879_p9 = scmp.lt.u32.totalorder %s875_s11, %s1035_s1 }
  0x17   :  { %p881_p10 = pnand %p879_p9, %p876_p8 }
  0x19   :  { %884 = shalt.err (!%p881_p10)
}
  0x1a   :  { %s885_s16 = scalar_lea.vmem %s31_s8, 512  ;;  %p890_p12 = scmp.lt.s32.totalorder %s31_s8, %s31_s8 }
  0x1b   :  { %p886_p11 = scmp.ne.s32.totalorder %s31_s8, %s885_s16  ;;  %p891_p13 = scmp.lt.s32.totalorder %s885_s16, %s885_s16 }
  0x1d   :  { %p892_p0 = por %p891_p13, %p890_p12 }
  0x1f   :  { %p893_p1 = pnand %p892_p0, %p886_p11 }
  0x21   :  { %896 = shalt.err (!%p893_p1)
}
  0x22   :  { %36 = dma.hbm_to_vmem [thread:$0]  %s1035_s1, 512, %s31_s8, [#allocation6], %s926_s28, %s926_s28, %s927_s29  }
  0x23   :  { %919 = dma.done.wait [#allocation3], 256  }
  0x24   :  { %920 = vsyncadd [#allocation3], 4294967040 }
  0x25   :  { %921 = dma.done.wait [#allocation6], 512  }
  0x26   :  { %922 = vsyncadd [#allocation6], 4294966784  ;;  %vm64_vm0 = vcmask 261120   ;;  %v49_v0 = vld [vmem:[#allocation5] sm:$0xff]  ;;  %v50_v1 = vld [vmem:[#allocation5 + $0x8] sm:$0xff]  ;;  %s929_s22 = smov [#allocation7]  }
  0x27   :  { %v51_v2 = vld [vmem:[#allocation5 + $0x10] sm:$0xff]  ;;  %v72_v3 = vand.u32 4294901760, %v49_v0  ;;  %v75_v4 = vand.u32 4294901760, %v50_v1  ;;  %v52_v5 = vld [vmem:[#allocation5 + $0x18] sm:$0xff]  ;;  %s662_s23 = sshll.u32 %s929_s22, 4  ;;  %s663_s23 = int_to_ptr.vmem [resolvable:$true] %s662_s23 }
  0x28   :  { %v78_v6 = vand.u32 4294901760, %v51_v2  ;;  %v56_v7 = vld [vmem:[#allocation2] sm:$0xff]  ;;  %v57_v8 = vld [vmem:[#allocation2 + $0x8] sm:$0xff]  ;;  %v81_v9 = vand.u32 4294901760, %v52_v5  ;;  %p902_p3 = scmp.lt.s32.totalorder %s663_s23, %s663_s23 }
  0x29   :  { %v66_v10 = vsel %vm64_vm0, %v56_v7, 0  ;;  %v69_v11 = vsel %vm64_vm0, %v57_v8, 0  ;;  %v780_v12 = vpack.c.bf16 %v75_v4, %v72_v3  ;;  %v162_v15 = vsub.f32 %v49_v0, %v72_v3  ;;  %v675_v46 = vld [vmem:[%s1036_s2] ss:$0 sm:$0xff] }
  0x2a   :  { %v992_v13 = vand.u32 4294901760, %v66_v10  ;;  %v994_v14 = vand.u32 4294901760, %v69_v11  ;;  %v784_v16 = vpack.c.bf16 %v81_v9, %v78_v6  ;;  %v169_v17 = vsub.f32 %v50_v1, %v75_v4 }
  0x2b   :  { %v176_v18 = vsub.f32 %v51_v2, %v78_v6  ;;  %v183_v19 = vsub.f32 %v52_v5, %v81_v9  ;;  %781 = vmatprep.subr.bf16.mxu1 %v780_v12  ;;  %805 = vmatprep.subr.bf16.mxu0 %v780_v12  ;;  %v163_v22 = vand.u32 4294901760, %v162_v15 }
  0x2c   :  { %v141_v20 = vsub.f32 %v66_v10, %v992_v13  ;;  %v151_v21 = vsub.f32 %v69_v11, %v994_v14  ;;  %783 = vmatpush3.bf16.msra.mxu1 %v780_v12  ;;  %807 = vmatpush3.bf16.msra.mxu0 %v780_v12  ;;  %v170_v23 = vand.u32 4294901760, %v169_v17  ;;  %v796_v44 = vpack.c.bf16 %v169_v17, %v162_v15 }
  0x2d   :  { %v177_v24 = vand.u32 4294901760, %v176_v18  ;;  %v184_v25 = vand.u32 4294901760, %v183_v19  ;;  %785 = vmatprep.subr.bf16.mxu1 %v784_v16  ;;  %809 = vmatprep.subr.bf16.mxu0 %v784_v16  ;;  %v164_v28 = vsub.f32 %v162_v15, %v163_v22  ;;  %v800_v45 = vpack.c.bf16 %v183_v19, %v176_v18 }
  0x2e   :  { %v142_v26 = vand.u32 4294901760, %v141_v20  ;;  %v152_v27 = vand.u32 4294901760, %v151_v21  ;;  %v171_v29 = vsub.f32 %v169_v17, %v170_v23  ;;  %v812_v30 = vpack.c.bf16 %v170_v23, %v163_v22  ;;  %v676_v23 = vld [vmem:[%s1037_s3] ss:$0 sm:$0xff]  ;;  %s897_s3 = scalar_lea.vmem %s663_s23, 256 }
  0x2f   :  { %v178_v31 = vsub.f32 %v176_v18, %v177_v24  ;;  %v185_v32 = vsub.f32 %v183_v19, %v184_v25  ;;  %v165_v35 = vand.u32 4294901760, %v164_v28  ;;  %v816_v43 = vpack.c.bf16 %v184_v25, %v177_v24  ;;  %v677_v25 = vld [vmem:[%s1038_s4] ss:$0 sm:$0xff]  ;;  %p898_p2 = scmp.ne.s32.totalorder %s663_s23, %s897_s3  ;;  %p903_p4 = scmp.lt.s32.totalorder %s897_s3, %s897_s3 }
  0x30   :  { %v143_v33 = vsub.f32 %v141_v20, %v142_v26  ;;  %755 = vmatprep.mubr.f32.mxu0 %v142_v26  ;;  %v153_v34 = vsub.f32 %v151_v21, %v152_v27  ;;  %787 = vmatpush3.bf16.msra.mxu1 %v784_v16  ;;  %v172_v36 = vand.u32 4294901760, %v171_v29 }
  0x31   :  { %811 = vmatpush3.bf16.msra.mxu0 %v784_v16  ;;  %v179_v37 = vand.u32 4294901760, %v178_v31  ;;  %v186_v38 = vand.u32 4294901760, %v185_v32  ;;  %p904_p5 = por %p903_p4, %p902_p3 }
  0x32   :  { %v144_v39 = vand.u32 4294901760, %v143_v33  ;;  %v154_v40 = vand.u32 4294901760, %v153_v34  ;;  %813 = vmatprep.subr.bf16.mxu0 %v812_v30  ;;  %v788_v41 = vpack.c.bf16 %v172_v36, %v165_v35 }
  0x33   :  { %v792_v42 = vpack.c.bf16 %v186_v38, %v179_v37  ;;  %p905_p6 = pnand %p904_p5, %p898_p2 }
  0x34   :  { %722 = vmatprep.mubr.f32.mxu1 %v144_v39  ;;  %756 = vmatmul.mubr.f32.vlgmr.msra.gmra.mrb[0].mxu0 %v152_v27 }
  0x35   :  { %723 = vmatmul.mubr.f32.vlgmr.msra.gmra.mrb[0].mxu1 %v154_v40  ;;  %789 = vmatprep.subr.bf16.mxu1 %v788_v41 }
  0x36   :  { %791 = vmatpush3.bf16.msra.mxu1 %v788_v41  ;;  %815 = vmatpush3.bf16.msra.mxu0 %v812_v30 }
  0x37   :  { %793 = vmatprep.subr.bf16.mxu1 %v792_v42  ;;  %817 = vmatprep.subr.bf16.mxu0 %v816_v43 }
  0x38   :  { %733 = vmatprep.mubr.f32.mxu1 %v992_v13  ;;  %766 = vmatprep.mubr.f32.mxu0 %v992_v13 }
  0x3a   :  { %795 = vmatpush3.bf16.msra.mxu1 %v792_v42  ;;  %819 = vmatpush3.bf16.msra.mxu0 %v816_v43 }
  0x3b   :  { %797 = vmatprep.subr.bf16.mxu1 %v796_v44  ;;  %821 = vmatprep.subr.bf16.mxu0 %v780_v12 }
  0x3d   :  { %734 = vmatmul.mubr.f32.vlgmr.msra.gmra.mrb[0].mxu1 %v994_v14  ;;  %767 = vmatmul.mubr.f32.vlgmr.msra.gmra.mrb[0].mxu0 %v994_v14 }
  0x3e   :  { %799 = vmatpush3.bf16.msra.mxu1 %v796_v44  ;;  %823 = vmatpush3.bf16.msra.mxu0 %v780_v12 }
  0x3f   :  { %801 = vmatprep.subr.bf16.mxu1 %v800_v45  ;;  %825 = vmatprep.subr.bf16.mxu0 %v784_v16 }
  0x40   :  { %744 = vmatprep.mubr.f32.mxu1 %v141_v20  ;;  %777 = vmatprep.mubr.f32.mxu0 %v992_v13 }
  0x42   :  { %803 = vmatpush3.bf16.msra.mxu1 %v800_v45  ;;  %827 = vmatpush3.bf16.msra.mxu0 %v784_v16 }
  0x45   :  { %745 = vmatmul.mubr.f32.vlgmr.msra.gmra.mrb[0].mxu1 %v151_v21  ;;  %778 = vmatmul.mubr.f32.vlgmr.msra.gmra.mrb[0].mxu0 %v994_v14 }
 0x118   :  { %v746_v47 = vpop.f32.mrb[0].mxu1  ;;  %v779_v48 = vpop.f32.mrb[0].mxu0 }
 0x119   :  { %v828_v49 = vadd.f32 %v746_v47, %v675_v46  ;;  %v333_v50 = vpop.f32.mrb[1].mxu1  ;;  %v589_v51 = vpop.f32.mrb[1].mxu0 }
 0x11a   :  { %v830_v52 = vadd.f32 %v675_v46, %v333_v50 }
 0x11b   :  { %v829_v53 = vadd.f32 %v828_v49, %v779_v48 }
 0x11c   :  { %v831_v54 = vadd.f32 %v830_v52, %v589_v51 }
 0x11d   :  { %v602_v55 = vmul.f32 0.70710677, %v829_v53  ;;  %v600_v60 = vmul.f32 0.5, %v829_v53 }
 0x11e   :  { %v601_v56 = vmul.f32 0.70710677, %v831_v54  ;;  %v599_v61 = vmul.f32 0.5, %v831_v54 }
 0x11f   :  { %845 = verf.f32 %v602_v55 }
 0x120   :  { %847 = verf.f32 %v601_v56 }
 0x129   :  { %v846_v57 = vpop.eup %845 }
 0x12a   :  { %v848_v58 = vpop.eup %847  ;;  %v606_v59 = vadd.f32 1.0, %v846_v57 }
 0x12b   :  { %v605_v62 = vadd.f32 1.0, %v848_v58 }
 0x12c   :  { %v608_v63 = vmul.f32 %v606_v59, %v600_v60 }
 0x12d   :  { %v607_v0 = vmul.f32 %v605_v62, %v599_v61 }
 0x12e   :  { %v616_v4 = vmul.f32 %v608_v63, %v608_v63  ;;  %v612_v5 = vsel %vm64_vm0, %v608_v63, 0.0 }
 0x12f   :  { %v609_v1 = vsel %vm64_vm0, %v607_v0, 0.0  ;;  %v615_v2 = vmul.f32 %v607_v0, %v607_v0 }
 0x130   :  { %610 = vadd.xlane.f32.xlu0 %v609_v1  ;;  %v620_v6 = vsel %vm64_vm0, %v616_v4, 0.0 }
 0x131   :  { %v617_v3 = vsel %vm64_vm0, %v615_v2, 0.0 }
 0x132   :  { %618 = vadd.xlane.f32.xlu1 %v617_v3 }
 0x134   :  { %613 = vadd.xlane.f32.xlu0 %v612_v5 }
 0x136   :  { %621 = vadd.xlane.f32.xlu1 %v620_v6 }
 0x1bd   :  { %v611_v7 = vpop.xlane.xlu0 %610 }
 0x1be   :  { %v623_v8 = vmul.f32 0.03125, %v611_v7 }
 0x1bf   :  { %v619_v9 = vpop.xlane.xlu1 %618 }
 0x1c0   :  { %v627_v10 = vmul.f32 %v623_v8, %v623_v8  ;;  %v625_v11 = vmul.f32 0.03125, %v619_v9  ;;  %v635_v21 = vsub.f32 %v607_v0, %v623_v8 }
 0x1c1   :  { %v614_v12 = vpop.xlane.xlu0 %613 }
 0x1c2   :  { %v629_v13 = vsub.f32 %v625_v11, %v627_v10  ;;  %v624_v14 = vmul.f32 0.03125, %v614_v12 }
 0x1c3   :  { %v622_v15 = vpop.xlane.xlu1 %621 }
 0x1c4   :  { %v631_v16 = vadd.f32 1e-12, %v629_v13  ;;  %v628_v17 = vmul.f32 %v624_v14, %v624_v14  ;;  %v626_v18 = vmul.f32 0.03125, %v622_v15  ;;  %v636_v26 = vsub.f32 %v608_v63, %v624_v14 }
 0x1c6   :  { %849 = vrsqrt.f32 %v631_v16  ;;  %v630_v19 = vsub.f32 %v626_v18, %v628_v17 }
 0x1c8   :  { %v632_v20 = vadd.f32 1e-12, %v630_v19 }
 0x1ca   :  { %851 = vrsqrt.f32 %v632_v20 }
 0x1d0   :  { %v850_v22 = vpop.eup %849 }
 0x1d1   :  { %v637_v24 = vmul.f32 %v850_v22, %v635_v21 }
 0x1d3   :  { %v645_v27 = vmul.f32 %v676_v23, %v637_v24 }
 0x1d4   :  { %v852_v28 = vpop.eup %851 }
 0x1d5   :  { %v638_v29 = vmul.f32 %v852_v28, %v636_v26  ;;  %v653_v30 = vadd.f32 %v677_v25, %v645_v27 }
 0x1d7   :  { %v646_v31 = vmul.f32 %v676_v23, %v638_v29  ;;  %655 = vst.msk [vmem:[#allocation7] sm:$0xff] %vm64_vm0, %v653_v30 }
 0x1d9   :  { %v654_v32 = vadd.f32 %v677_v25, %v646_v31 }
 0x1db   :  { %656 = vst.msk [vmem:[#allocation7 + $0x8] sm:$0xff] %vm64_vm0, %v654_v32 }
 0x1dc   :  { %908 = shalt.err (!%p905_p6)
}
 0x1dd   :  { %s909_s25 = scalar_lea.hbm %s1039_s5, 256 }
 0x1de   :  { %p910_p7 = scmp.ne.s32.totalorder %s1039_s5, %s909_s25  ;;  %p913_p8 = scmp.lt.u32.totalorder %s909_s25, %s1039_s5 }
 0x1e0   :  { %p915_p9 = pnand %p913_p8, %p910_p7 }
 0x1e2   :  { %918 = shalt.err (!%p915_p9)
}
 0x1e3   :  { %668 = dma.vmem_to_hbm [thread:$0]  %s663_s23, 256, %s1039_s5, [#allocation4], %s926_s28, %s926_s28, %s927_s29  }
 0x1e4   :  { %923 = dma.done.wait [#allocation4], 256  }
 0x1e5   :  { %924 = vsyncadd [#allocation4], 4294967040 }
 0x1e6   :  { %672 = vsyncpa [#allocation3], 1 }
 0x1e7   :  { %673 = vsyncpa [#allocation6], 1 }
 0x1e8   :  { %674 = vsyncpa [#allocation4], 1 }

</bundles_post_ra>
